<compile_context>
chip_gen: v7x
topology: tpu7x:2x2x1
jax: 0.10.0
libtpu: 0.0.40
codegen_flags: <defaults>
</compile_context>

<pallas_src>
import functools

import jax
import jax.numpy as jnp
from jax.experimental import pallas as pl
from jax.experimental.pallas import tpu as pltpu


def _round_up(x, m):
    return ((x + m - 1) // m) * m


def _cdiv(a, b):
    return (a + b - 1) // b


def _fully_loss_kernel(out_ref, lab_ref, bm_ref, loss_ref, acc_ref, *,
                       batch_size, tile_rows, tiles_per_half, binary_labels):
    half = pl.program_id(0)
    j = pl.program_id(1)

    @pl.when(j == 0)
    def _init():
        acc_ref[...] = jnp.zeros_like(acc_ref)

    p = out_ref[...].astype(jnp.float32)   # [tb, C] probabilities in (0, 1)
    y = lab_ref[...].astype(jnp.float32)   # [tb, C] targets
    bm = bm_ref[...]                       # [tb, 1] batch-selection mask (0/1)

    # Row validity for the (possibly ragged / duplicated) tile: rows >= B carry garbage
    # from the partially-out-of-bounds DMA and must be select-discarded (0 * NaN = NaN,
    # so masking has to be a select, not a multiply).
    row0 = (half * tiles_per_half + j) * tile_rows
    rows = row0 + jax.lax.broadcasted_iota(jnp.int32, (tile_rows, 1), 0)
    valid = rows < batch_size              # [tb, 1] bool

    # torch.nn.BCELoss clamps the log terms at -100.
    if binary_labels:
        # Exact for y in {0, 1}: a single transcendental per element (EUP relief on v7x).
        bce = -jnp.maximum(jnp.log(jnp.where(y > 0.5, p, 1.0 - p)), -100.0)
    else:
        log_p = jnp.maximum(jnp.log(p), -100.0)
        log_1mp = jnp.maximum(jnp.log(1.0 - p), -100.0)
        bce = -(log_1mp + y * (log_p - log_1mp))   # == -(y*log p + (1-y)*log(1-p))

    contrib = jnp.where(valid, bce * bm, 0.0)      # [tb, C]
    acc_ref[...] += jnp.sum(contrib, axis=0, keepdims=True)   # per-class partial sums

    @pl.when(j == pl.num_programs(1) - 1)
    def _finalize():
        loss_ref[...] = acc_ref[...].reshape(loss_ref.shape)


def fully_loss(output, label, batch_mask, class_mask, *, block_rows=None,
               binary_labels=False):
    """output, label: [B, C]; batch_mask: [B]; class_mask: [C]. Returns scalar loss."""
    B, C = output.shape
    itemsize = jnp.dtype(output.dtype).itemsize
    c_lanes = _round_up(C, 128)                       # lane-padded width for VMEM sizing
    sub_mult = 8 * max(1, 4 // itemsize)              # 8 for f32, 16 for bf16, ...

    # Generation-aware VMEM budget (v7x has 64 MiB physical per TC; v5e/v6e have 128 MiB).
    try:
        info = pltpu.get_tpu_info()
        vmem_phys = int(getattr(info, "vmem_capacity_bytes", 64 * 1024 * 1024))
    except Exception:  # pragma: no cover - conservative fallback
        vmem_phys = 64 * 1024 * 1024
    if vmem_phys >= 128 * 1024 * 1024:                # v5e / v6e
        vmem_budget, vmem_limit = 80 * 1024 * 1024, 100 * 1024 * 1024
    else:                                             # v7x
        vmem_budget, vmem_limit = 24 * 1024 * 1024, 32 * 1024 * 1024

    # Row tile: as big as the budget allows (2 big inputs x 2 pipeline buffers), capped.
    per_row_bytes = 4 * c_lanes * itemsize            # 2 inputs * 2 buffers, per row
    max_rows = max(sub_mult,
                   min(16384, (vmem_budget // per_row_bytes) // sub_mult * sub_mult))
    tb = min(_round_up(B, sub_mult), max_rows)
    if block_rows is not None:
        tb = max(sub_mult, min(tb, _round_up(block_rows, sub_mult)))

    n_tiles = _cdiv(B, tb)                 # row tiles over the *unpadded* batch
    halves = 2 if n_tiles >= 2 else 1      # 2-TC split on v7x; harmless elsewhere
    tph = _cdiv(n_tiles, halves)           # tiles per half
    last_tile = n_tiles - 1

    # Only the tiny batch-mask vector is padded; the big operands are passed as-is.
    B_pad = halves * tph * tb
    bm_col = jnp.pad(batch_mask.astype(jnp.float32), (0, B_pad - B)).reshape(B_pad, 1)

    def row_map(i, j):
        # Clamp so a duplicate tail tile (when n_tiles is odd) never indexes a fully
        # out-of-bounds block; its contribution is zeroed by the in-kernel row mask.
        return (jnp.minimum(i * tph + j, last_tile), 0)

    kernel = functools.partial(
        _fully_loss_kernel,
        batch_size=B, tile_rows=tb, tiles_per_half=tph, binary_labels=binary_labels)

    per_class = pl.pallas_call(
        kernel,
        out_shape=jax.ShapeDtypeStruct((halves, 1, C), jnp.float32),
        grid_spec=pltpu.PrefetchScalarGridSpec(
            num_scalar_prefetch=0,
            grid=(halves, tph),
            in_specs=[
                pl.BlockSpec((tb, C), row_map),                      # output tile
                pl.BlockSpec((tb, C), row_map),                      # label tile
                pl.BlockSpec((tb, 1), lambda i, j: (i * tph + j, 0)),  # batch mask col
            ],
            out_specs=pl.BlockSpec((1, 1, C), lambda i, j: (i, 0, 0)),
            scratch_shapes=[pltpu.VMEM((1, C), jnp.float32)],
        ),
        compiler_params=pltpu.CompilerParams(
            dimension_semantics=("parallel", "arbitrary"),
            vmem_limit_bytes=vmem_limit,
        ),
        cost_estimate=pl.CostEstimate(
            flops=6 * B * C,
            transcendentals=(1 if binary_labels else 2) * B * C,
            bytes_accessed=2 * B * C * itemsize + (B + halves * C) * 4,
        ),
    )(output, label, bm_col)

    # Class mask, final lane reduction, denominator and 0/0 guard are cheap wrapper work.
    cm = class_mask.astype(jnp.float32)
    total = jnp.sum(jnp.sum(per_class, axis=(0, 1)) * cm)
    cnt = jnp.sum(batch_mask.astype(jnp.float32)) * jnp.sum(cm)
    # NOTE: torch would produce NaN (0/0) when nothing is selected; we return 0.0.
    return jnp.where(cnt > 0, total / cnt, jnp.float32(0.0))


def build_masks(source, target_source, label_mapping, class_interests, B, C):
    """Host-side glue reproducing the (b, c) selection of the PyTorch double loop.

    Returns the factored batch mask [B] and class mask [C]; their outer product is
    exactly the dense selection mask of the reference module."""
    batch_mask = jnp.array(
        [1.0 if s in target_source else 0.0 for s in source], dtype=jnp.float32
    )
    classes = [label_mapping[c] for c in class_interests]
    class_mask = jnp.zeros((C,), dtype=jnp.float32).at[jnp.array(classes)].set(1.0)
    return batch_mask, class_mask


def fully_loss_ref(output, label, batch_mask, class_mask):
    """Pure-JAX reference (matches torch semantics incl. the -100 log clamp)."""
    log_p = jnp.maximum(jnp.log(output), -100.0)
    log_1mp = jnp.maximum(jnp.log(1.0 - output), -100.0)
    bce = -(label * log_p + (1.0 - label) * log_1mp)
    m = batch_mask[:, None] * class_mask[None, :]
    return jnp.sum(bce * m) / jnp.sum(m)


if __name__ == "__main__":
    key = jax.random.PRNGKey(0)

    target_source = {"hospital_a", "hospital_c"}
    class_interests = ["edema", "effusion", "atelectasis"]
    label_mapping = {"edema": 1, "effusion": 4, "atelectasis": 9}

    # --- Test 1: toy shapes from the spec (single tile, single grid half) ---
    B, C = 8, 16
    k1, k2, k3, k4 = jax.random.split(key, 4)
    output = jax.nn.sigmoid(jax.random.normal(k1, (B, C), dtype=jnp.float32))
    label = jax.random.bernoulli(k2, p=0.5, shape=(B, C)).astype(jnp.float32)
    source = ["hospital_a", "hospital_b", "hospital_a", "hospital_c",
              "hospital_a", "hospital_b", "hospital_c", "hospital_a"]
    bm, cm = build_masks(source, target_source, label_mapping, class_interests, B, C)

    loss = fully_loss(output, label, bm, cm)
    jax.block_until_ready(loss)
    ref = fully_loss_ref(output, label, bm, cm)
    assert jnp.allclose(loss, ref, rtol=1e-5, atol=1e-5), (loss, ref)

    # --- Test 2: ragged batch, multi-tile 2D grid (parallel halves + clamped tail) ---
    B2, C2 = 41, 16
    output2 = jax.nn.sigmoid(jax.random.normal(k3, (B2, C2), dtype=jnp.float32))
    label2 = jax.random.bernoulli(k4, p=0.5, shape=(B2, C2)).astype(jnp.float32)
    source2 = [["hospital_a", "hospital_b", "hospital_c"][i % 3] for i in range(B2)]
    bm2, cm2 = build_masks(source2, target_source, label_mapping, class_interests, B2, C2)

    loss2 = fully_loss(output2, label2, bm2, cm2, block_rows=16)  # 3 row tiles, 2 halves
    jax.block_until_ready(loss2)
    ref2 = fully_loss_ref(output2, label2, bm2, cm2)
    assert jnp.allclose(loss2, ref2, rtol=1e-5, atol=1e-5), (loss2, ref2)

    # --- Test 3: binary-labels fast path (single log per element), same data ---
    loss3 = fully_loss(output2, label2, bm2, cm2, block_rows=16, binary_labels=True)
    jax.block_until_ready(loss3)
    assert jnp.allclose(loss3, ref2, rtol=1e-5, atol=1e-5), (loss3, ref2)

    print("KERNEL_OK")
</pallas_src>

<mosaic_0001>
module attributes {stable_mosaic.version = 11 : i64} {
  func.func @_fully_loss_kernel(%arg0: i32, %arg1: i32, %arg2: memref<8x16xf32, #tpu.memory_space<vmem>>, %arg3: memref<8x16xf32, #tpu.memory_space<vmem>>, %arg4: memref<8x1xf32, #tpu.memory_space<vmem>>, %arg5: memref<1x1x16xf32, #tpu.memory_space<vmem>>, %arg6: memref<1x16xf32, #tpu.memory_space<vmem>>) attributes {dimension_semantics = [#tpu.dimension_semantics<parallel>, #tpu.dimension_semantics<arbitrary>], iteration_bounds = array<i64: 1, 1>, scalar_prefetch = 0 : i64, scratch_operands = 1 : i64, tpu.core_type = #tpu.core_type<tc>, window_params = [{transform_indices = @transform_0, window_bounds = array<i64: 8, 16>}, {transform_indices = @transform_1, window_bounds = array<i64: 8, 16>}, {transform_indices = @transform_2, window_bounds = array<i64: 8, 1>}, {transform_indices = @transform_3, window_bounds = array<i64: 1, 1, 16>}]} {
    %c0_i32 = arith.constant 0 : i32
    %0 = arith.cmpi eq, %arg1, %c0_i32 : i32
    %1 = arith.extui %0 : i1 to i32
    %c0_i32_0 = arith.constant 0 : i32
    %2 = arith.cmpi ne, %1, %c0_i32_0 : i32
    scf.if %2 {
      %cst_18 = arith.constant 0.000000e+00 : f32
      %41 = vector.broadcast %cst_18 : f32 to vector<1x16xf32>
      %c0_19 = arith.constant 0 : index
      %c0_20 = arith.constant 0 : index
      %42 = vector.load %arg6[%c0_19, %c0_20] : memref<1x16xf32, #tpu.memory_space<vmem>>, vector<1x16xf32>
      tpu.vector_store %arg6[%c0_19, %c0_20], %41 {strides = array<i32>} : memref<1x16xf32, #tpu.memory_space<vmem>>, vector<1x16xf32>,
    } else {
    }
    %c0 = arith.constant 0 : index
    %c0_1 = arith.constant 0 : index
    %3 = vector.load %arg2[%c0, %c0_1] : memref<8x16xf32, #tpu.memory_space<vmem>>, vector<8x16xf32>
    %c0_2 = arith.constant 0 : index
    %c0_3 = arith.constant 0 : index
    %4 = vector.load %arg3[%c0_2, %c0_3] : memref<8x16xf32, #tpu.memory_space<vmem>>, vector<8x16xf32>
    %c0_4 = arith.constant 0 : index
    %c0_5 = arith.constant 0 : index
    %5 = vector.load %arg4[%c0_4, %c0_5] : memref<8x1xf32, #tpu.memory_space<vmem>>, vector<8x1xf32>
    %c1_i32 = arith.constant 1 : i32
    %6 = arith.muli %arg0, %c1_i32 : i32
    %7 = arith.addi %6, %arg1 : i32
    %c8_i32 = arith.constant 8 : i32
    %8 = arith.muli %7, %c8_i32 : i32
    %9 = tpu.iota {dimensions = array<i32: 0>} : vector<8x1xi32>
    %10 = vector.broadcast %8 : i32 to vector<8x1xi32>
    %11 = arith.addi %10, %9 : vector<8x1xi32>
    %c8_i32_6 = arith.constant 8 : i32
    %12 = vector.broadcast %c8_i32_6 : i32 to vector<8x1xi32>
    %13 = arith.cmpi slt, %11, %12 : vector<8x1xi32>
    %14 = math.log %3 : vector<8x16xf32>
    %cst = arith.constant -1.000000e+02 : f32
    %15 = vector.broadcast %cst : f32 to vector<8x16xf32>
    %16 = arith.maximumf %14, %15 : vector<8x16xf32>
    %cst_7 = arith.constant 1.000000e+00 : f32
    %17 = vector.broadcast %cst_7 : f32 to vector<8x16xf32>
    %18 = arith.subf %17, %3 : vector<8x16xf32>
    %19 = math.log %18 : vector<8x16xf32>
    %cst_8 = arith.constant -1.000000e+02 : f32
    %20 = vector.broadcast %cst_8 : f32 to vector<8x16xf32>
    %21 = arith.maximumf %19, %20 : vector<8x16xf32>
    %22 = arith.subf %16, %21 : vector<8x16xf32>
    %23 = arith.mulf %4, %22 : vector<8x16xf32>
    %24 = arith.addf %21, %23 : vector<8x16xf32>
    %cst_9 = arith.constant 0.000000e+00 : f32
    %25 = vector.broadcast %cst_9 : f32 to vector<8x16xf32>
    %26 = arith.subf %25, %24 : vector<8x16xf32>
    %27 = vector.broadcast %5 : vector<8x1xf32> to vector<8x16xf32>
    %28 = arith.mulf %26, %27 : vector<8x16xf32>
    %cst_10 = arith.constant 0.000000e+00 : f32
    %29 = vector.shape_cast %13 : vector<8x1xi1> to vector<8x1xi1>
    %30 = vector.broadcast %29 : vector<8x1xi1> to vector<8x16xi1>
    %31 = vector.broadcast %cst_10 : f32 to vector<8x16xf32>
    %32 = arith.select %30, %28, %31 : vector<8x16xi1>, vector<8x16xf32>
    %c0_11 = arith.constant 0 : index
    %c0_12 = arith.constant 0 : index
    %33 = vector.load %arg6[%c0_11, %c0_12] : memref<1x16xf32, #tpu.memory_space<vmem>>, vector<1x16xf32>
    %cst_13 = arith.constant dense<0.000000e+00> : vector<16xf32>
    %34 = vector.multi_reduction <add>, %32, %cst_13 [0] : vector<8x16xf32> to vector<16xf32>
    %35 = vector.shape_cast %34 : vector<16xf32> to vector<1x16xf32>
    %36 = arith.addf %33, %35 : vector<1x16xf32>
    %c0_14 = arith.constant 0 : index
    %c0_15 = arith.constant 0 : index
    %37 = vector.load %arg6[%c0_14, %c0_15] : memref<1x16xf32, #tpu.memory_space<vmem>>, vector<1x16xf32>
    tpu.vector_store %arg6[%c0_14, %c0_15], %36 {strides = array<i32>} : memref<1x16xf32, #tpu.memory_space<vmem>>, vector<1x16xf32>,
    %c0_i32_16 = arith.constant 0 : i32
    %38 = arith.cmpi eq, %arg1, %c0_i32_16 : i32
    %39 = arith.extui %38 : i1 to i32
    %c0_i32_17 = arith.constant 0 : i32
    %40 = arith.cmpi ne, %39, %c0_i32_17 : i32
    scf.if %40 {
      %c0_18 = arith.constant 0 : index
      %c0_19 = arith.constant 0 : index
      %41 = vector.load %arg6[%c0_18, %c0_19] : memref<1x16xf32, #tpu.memory_space<vmem>>, vector<1x16xf32>
      %42 = vector.shape_cast %41 : vector<1x16xf32> to vector<1x1x16xf32>
      %c0_20 = arith.constant 0 : index
      %c0_21 = arith.constant 0 : index
      %c0_22 = arith.constant 0 : index
      %43 = vector.load %arg5[%c0_20, %c0_21, %c0_22] : memref<1x1x16xf32, #tpu.memory_space<vmem>>, vector<1x1x16xf32>
      tpu.vector_store %arg5[%c0_20, %c0_21, %c0_22], %42 {strides = array<i32>} : memref<1x1x16xf32, #tpu.memory_space<vmem>>, vector<1x1x16xf32>,
    } else {
    }
    return
  }
  func.func @transform_0(%arg0: i32, %arg1: i32) -> (i32, i32) {
    %c1_i32 = arith.constant 1 : i32
    %0 = arith.muli %arg0, %c1_i32 : i32
    %1 = arith.addi %0, %arg1 : i32
    %c0_i32 = arith.constant 0 : i32
    %2 = arith.minsi %1, %c0_i32 : i32
    %c0_i32_0 = arith.constant 0 : i32
    %c0_i32_1 = arith.constant 0 : i32
    return %2, %c0_i32_0 : i32, i32
  }
  func.func @transform_1(%arg0: i32, %arg1: i32) -> (i32, i32) {
    %c1_i32 = arith.constant 1 : i32
    %0 = arith.muli %arg0, %c1_i32 : i32
    %1 = arith.addi %0, %arg1 : i32
    %c0_i32 = arith.constant 0 : i32
    %2 = arith.minsi %1, %c0_i32 : i32
    %c0_i32_0 = arith.constant 0 : i32
    %c0_i32_1 = arith.constant 0 : i32
    return %2, %c0_i32_0 : i32, i32
  }
  func.func @transform_2(%arg0: i32, %arg1: i32) -> (i32, i32) {
    %c1_i32 = arith.constant 1 : i32
    %0 = arith.muli %arg0, %c1_i32 : i32
    %1 = arith.addi %0, %arg1 : i32
    %c0_i32 = arith.constant 0 : i32
    %c0_i32_0 = arith.constant 0 : i32
    return %1, %c0_i32 : i32, i32
  }
  func.func @transform_3(%arg0: i32, %arg1: i32) -> (i32, i32, i32) {
    %c0_i32 = arith.constant 0 : i32
    %c0_i32_0 = arith.constant 0 : i32
    %c0_i32_1 = arith.constant 0 : i32
    return %arg0, %c0_i32, %c0_i32_0 : i32, i32, i32
  }
}

</mosaic_0001>

<bundles_post_ra>
// kernel: tpu_custom_call.1
= control target key start
LH: loop header
LB: loop body
LE: loop exit
PB: predicated region body
PF: predicated region fallthrough
CT: control target
= control target key end

     0   :  { %8 = vsyncpa [#allocation4], 0  ;;  %s275_s0 = inlined_call_operand.vmem [shape: f32[8,16], index: 0, kind: input, shape index: {}]   ;;  %s276_s1 = inlined_call_operand.hbm [shape: f32[8,16], index: 1, kind: input, shape index: {}]   ;;  %s277_s2 = inlined_call_operand.vmem [shape: f32[8,1], index: 2, kind: input, shape index: {}]   ;;  %s278_s3 = inlined_call_operand.hbm [shape: f32[1,1,16], index: 3, kind: output, shape index: {}]  }
   0x1   :  { %9 = vsyncpa [#allocation5], 0  ;;  %s218_s12 = smov [#allocation3]   ;;  %s170_s16 = scalar_lea.hbm %s276_s1, 128 }
   0x2   :  { %s33_s13 = sshll.u32 %s218_s12, 4  ;;  %p171_p0 = scmp.ne.s32.totalorder %s276_s1, %s170_s16  ;;  %s34_s13 = int_to_ptr.vmem [resolvable:$true] %s33_s13 }
   0x3   :  { %p174_p1 = scmp.lt.u32.totalorder %s170_s16, %s276_s1 }
   0x5   :  { %p176_p2 = pnand %p174_p1, %p171_p0 }
   0x7   :  { %179 = shalt.err (!%p176_p2)
}
   0x8   :  { %s180_s21 = scalar_lea.vmem %s34_s13, 128  ;;  %p185_p4 = scmp.lt.s32.totalorder %s34_s13, %s34_s13 }
   0x9   :  { %p181_p3 = scmp.ne.s32.totalorder %s34_s13, %s180_s21  ;;  %p186_p5 = scmp.lt.s32.totalorder %s180_s21, %s180_s21 }
   0xb   :  { %p187_p6 = por %p186_p5, %p185_p4 }
   0xd   :  { %p188_p7 = pnand %p187_p6, %p181_p3 }
   0xf   :  { %191 = shalt.err (!%p188_p7)
}
  0x10   :  { %36 = dma.hbm_to_vmem [thread:$0]  %s276_s1, 128, %s34_s13, [#allocation4]  }
  0x11   :  { %214 = dma.done.wait [#allocation4], 128  }
  0x12   :  { %215 = vsyncadd [#allocation4], 4294967168  ;;  %v219_v0 = vmov 0   ;;  %v87_v1 = vld [vmem:[%s277_s2] sm:$0xff]  ;;  %vm83_vm0 = vcmask 122880   ;;  %v220_v2 = vmov 0.0  }
  0x13   :  { %165 = vset.pattern.permute.xlu0 %v219_v0  ;;  %84 = vst.msk [vmem:[#allocation2] sm:$0x1] %vm83_vm0, %v220_v2  ;;  %v85_v3 = vld [vmem:[%s275_s0] sm:$0xff]  ;;  %vm116_vm1 = vcmask 130048   ;;  %s221_s0 = smov [#allocation6]  }
  0x14   :  { %108 = vperm.xlu0 %165, %v87_v1   ;;  %v98_v4 = vsub.f32 1.0, %v85_v3  ;;  %166 = vlog2.f32 %v85_v3  ;;  %v86_v12 = vld [vmem:[#allocation3] sm:$0xff]  ;;  %s138_s1 = sshll.u32 %s221_s0, 4  ;;  %s139_s1 = int_to_ptr.vmem [resolvable:$true] %s138_s1 }
  0x15   :  { %s192_s2 = scalar_lea.vmem %s139_s1, 16  ;;  %s196_s28 = scalar_lea.vmem %s139_s1, 32 }
  0x16   :  { %168 = vlog2.f32 %v98_v4  ;;  %p193_p8 = scmp.ne.s32.totalorder %s139_s1, %s192_s2  ;;  %p197_p9 = scmp.lt.s32.totalorder %s139_s1, %s139_s1 }
  0x17   :  { %p198_p10 = scmp.lt.s32.totalorder %s196_s28, %s192_s2 }
  0x19   :  { %p199_p11 = por %p198_p10, %p197_p9 }
  0x1a   :  { %v115_v24 = vld [vmem:[#allocation2] sm:$0x1] }
  0x1b   :  { %p200_p12 = pnand %p199_p11, %p193_p8 }
  0x1e   :  { %v167_v5 = vpop.eup %166 }
  0x1f   :  { %v96_v7 = vmul.f32 0.6931472, %v167_v5 }
  0x20   :  { %v169_v6 = vpop.eup %168 }
  0x21   :  { %v100_v8 = vmul.f32 0.6931472, %v169_v6  ;;  %v97_v9 = vmax.f32 %v96_v7, -100.0 }
  0x23   :  { %v101_v10 = vmax.f32 %v100_v8, -100.0 }
  0x25   :  { %v102_v11 = vsub.f32 %v97_v9, %v101_v10 }
  0x27   :  { %v103_v13 = vmul.f32 %v102_v11, %v86_v12 }
  0x29   :  { %v104_v14 = vadd.f32 %v103_v13, %v101_v10 }
  0x2b   :  { %v105_v15 = vsub.f32 0.0, %v104_v14 }
  0x93   :  { %v109_v16 = vpop.permute.xlu0 %108 }
  0x94   :  { %v111_v17 = vmul.f32 %v109_v16, %v105_v15 }
  0x96   :  { %v117_v18 = vsel %vm116_vm1, %v111_v17, 0.0 }
  0x97   :  { %v118_v19 = vrot.slane %v117_v18, 4 }
  0x99   :  { %v119_v20 = vadd.f32 %v118_v19, %v117_v18 }
  0x9b   :  { %v120_v21 = vrot.slane %v119_v20, 2 }
  0x9d   :  { %v121_v22 = vadd.f32 %v120_v21, %v119_v20 }
  0x9f   :  { %v122_v23 = vrot.slane %v121_v22, 1 }
  0xa1   :  { %v123_v25 = vadd.f32 %v122_v23, %v121_v22 }
  0xa3   :  { %v124_v26 = vadd.f32 %v123_v25, %v115_v24 }
  0xa5   :  { %126 = vst.msk [vmem:[#allocation2] sm:$0x1] %vm83_vm0, %v124_v26 }
  0xac   :  { %v130_v27 = vld [vmem:[#allocation2] sm:$0x1] }
  0xad   :  { %131 = vst.msk [vmem:[#allocation6] sm:$0x1] %vm83_vm0, %v130_v27 }
  0xae   :  { %203 = shalt.err (!%p200_p12)
}
  0xaf   :  { %s204_s4 = scalar_lea.hbm %s278_s3, 16 }
  0xb0   :  { %p205_p13 = scmp.ne.s32.totalorder %s278_s3, %s204_s4  ;;  %p208_p0 = scmp.lt.u32.totalorder %s204_s4, %s278_s3 }
  0xb2   :  { %p210_p1 = pnand %p208_p0, %p205_p13 }
  0xb4   :  { %213 = shalt.err (!%p210_p1)
}
  0xb5   :  { %141 = dma.vmem_to_hbm [thread:$0]  %s139_s1, 16, %s278_s3, [#allocation5]  }
  0xb6   :  { %216 = dma.done.wait [#allocation5], 16  }
  0xb7   :  { %217 = vsyncadd [#allocation5], 4294967280 }
  0xb8   :  { %145 = vsyncpa [#allocation4], 1 }
  0xb9   :  { %146 = vsyncpa [#allocation5], 1 }

</bundles_post_ra>
